<compile_context>
chip_gen: v5e
topology: v5e:2x2
jax: 0.10.0
libtpu: 0.0.40
codegen_flags: <defaults>
</compile_context>

<pallas_src>
import functools
import math

import jax
import jax.numpy as jnp
from jax.experimental import pallas as pl
from jax.experimental.pallas import tpu as pltpu


# --------------------------------------------------------------------------
# Kernels
# --------------------------------------------------------------------------

def _gate(h0, h1, wo_dtype, *, approximate, gate_dtype):
    """act(h0) * h1 computed in gate_dtype, cast for the wo matmul."""
    # TODO(synk): only GELU (erf / tanh) is implemented; other ACT2FN entries
    #             (relu, silu, ...) would need their own branch.
    g = jax.nn.gelu(h0.astype(gate_dtype), approximate=approximate)
    h = (g * h1.astype(gate_dtype)).astype(wo_dtype)
    # TODO(synk): dropout between the gate and wo is identity in eval mode.
    return h


def _tiled_body(x_ref, w0_ref, w1_ref, wo_ref, acc_ref, *, approximate, gate_dtype):
    """One d_ff chunk of the gated hidden state, folded into acc_ref."""
    x = x_ref[...]                                                     # [tm, d_model]
    h0 = jnp.dot(x, w0_ref[...], preferred_element_type=jnp.float32)  # [tm, tf]
    h1 = jnp.dot(x, w1_ref[...], preferred_element_type=jnp.float32)  # [tm, tf]
    h = _gate(h0, h1, wo_ref.dtype, approximate=approximate, gate_dtype=gate_dtype)
    acc_ref[...] += jnp.dot(h, wo_ref[...], preferred_element_type=jnp.float32)


def _tiled_kernel_f32out(x_ref, w0_ref, w1_ref, wo_ref, o_ref, *,
                         approximate, gate_dtype):
    """f32 output: accumulate directly in o_ref (resident across the j axis)."""
    @pl.when(pl.program_id(1) == 0)
    def _():
        o_ref[...] = jnp.zeros_like(o_ref)

    _tiled_body(x_ref, w0_ref, w1_ref, wo_ref, o_ref,
                approximate=approximate, gate_dtype=gate_dtype)


def _tiled_kernel_scratch(x_ref, w0_ref, w1_ref, wo_ref, o_ref, acc_ref, *,
                          approximate, gate_dtype):
    """Non-f32 output: f32 VMEM accumulator, cast once on the last d_ff step."""
    j = pl.program_id(1)

    @pl.when(j == 0)
    def _():
        acc_ref[...] = jnp.zeros_like(acc_ref)

    _tiled_body(x_ref, w0_ref, w1_ref, wo_ref, acc_ref,
                approximate=approximate, gate_dtype=gate_dtype)

    @pl.when(j == pl.num_programs(1) - 1)
    def _():
        o_ref[...] = acc_ref[...].astype(o_ref.dtype)


def _resident_kernel(x_ref, w0_ref, w1_ref, wo_ref, o_ref, *,
                     approximate, gate_dtype):
    """Weights fully VMEM-resident: whole d_ff in one step, no accumulator."""
    x = x_ref[...]
    h0 = jnp.dot(x, w0_ref[...], preferred_element_type=jnp.float32)
    h1 = jnp.dot(x, w1_ref[...], preferred_element_type=jnp.float32)
    h = _gate(h0, h1, wo_ref.dtype, approximate=approximate, gate_dtype=gate_dtype)
    o_ref[...] = jnp.dot(h, wo_ref[...],
                         preferred_element_type=jnp.float32).astype(o_ref.dtype)


# --------------------------------------------------------------------------
# Tile selection
# --------------------------------------------------------------------------

_M_STEPS = (256, 128, 16, 8)   # 16+ keeps bf16 sublane packing clean


def _largest_divisor_tile(dim, cap, steps):
    """Largest t <= cap with dim % t == 0 and t a multiple of some step."""
    cap = min(cap, dim)
    for step in steps:
        if step > cap:
            continue
        t = cap - cap % step
        while t >= step:
            if dim % t == 0:
                return t
            t -= step
    return dim  # full extent is always a legal block shape


def _even_m_tiles(M, tm, floor, step=16):
    """If M//tm is odd (>1), shrink tm (not below floor) to make it even (v7x)."""
    n = M // tm
    if n <= 1 or n % 2 == 0:
        return tm
    t = tm - (tm % step)
    while t >= max(floor, step):
        if M % t == 0 and (M // t) % 2 == 0:
            return t
        t -= step
    return tm


def _choose_config(M, d_model, d_ff, in_bytes, out_bytes, gate_bytes,
                   f32_out, budget):
    # TODO(synk): ragged M (no divisor that is a multiple of 8) falls back to a
    #             single full-M tile; pad M outside the kernel for such shapes.

    def temporaries(tm, tf):
        # h0/h1 f32 MXU outputs + gate product + cast copy fed to the wo matmul.
        return tm * tf * (4 + 4 + gate_bytes + in_bytes)

    def io_tiles(tm):
        acc = 0 if f32_out else tm * d_model * 4
        return 2 * tm * d_model * (in_bytes + out_bytes) + acc

    w_full = 3 * d_model * d_ff * in_bytes

    # --- Weights-resident candidate: constant-index weight blocks are DMA'd
    #     exactly once, so tm can stay modest without re-streaming weights. ---
    tm_res = _largest_divisor_tile(M, 512, _M_STEPS)

    def est_res(t):
        return 2 * w_full + io_tiles(t) + temporaries(t, d_ff)

    while est_res(tm_res) > budget and tm_res > 16:
        smaller = _largest_divisor_tile(M, max(16, tm_res // 2), _M_STEPS)
        if smaller >= tm_res:
            break
        tm_res = smaller
    if est_res(tm_res) <= budget:
        return "resident", _even_m_tiles(M, tm_res, floor=128), d_ff

    # --- Tiled d_ff reduction: tm big enough to hide weight streaming behind
    #     the MXU (~600+ rows at bf16 on v6e/v7x) -> cap 1024, no M//2 cap. ---
    tm = _largest_divisor_tile(M, 1024, _M_STEPS)
    tf = _largest_divisor_tile(d_ff, 1024, (128,))

    def est(tm_, tf_):
        w_buf = 2 * 3 * d_model * tf_ * in_bytes   # double-buffered weight chunks
        return w_buf + io_tiles(tm_) + temporaries(tm_, tf_)

    for _ in range(32):
        if est(tm, tf) <= budget:
            break
        if tf > 128:
            smaller = _largest_divisor_tile(d_ff, max(128, tf // 2), (128,))
            if smaller < tf:
                tf = smaller
                continue
        smaller = _largest_divisor_tile(M, max(16, tm // 2), _M_STEPS)
        if smaller < tm:
            tm = smaller
            continue
        break
    # Only even out the tile count if tm can stay >= 512 (protects the v5e/v6e
    # weight-streaming roofline while balancing v7x megacore).
    return "tiled", _even_m_tiles(M, tm, floor=512), tf


# --------------------------------------------------------------------------
# Host-side wrappers
# --------------------------------------------------------------------------

def prepare_t5_ffn_weights(wi_0, wi_1, wo, compute_dtype=jnp.bfloat16):
    """Call ONCE at weight-load time (hoists cast + transpose off the hot path).

    wi_0, wi_1: [d_ff, d_model]; wo: [d_model, d_ff]  (PyTorch nn.Linear layout)
    Returns (w0t, w1t, wot) = ([d_model, d_ff], [d_model, d_ff], [d_ff, d_model])
    in `compute_dtype` (use jnp.float32 as a full-precision escape hatch).
    """
    w0t = jnp.asarray(wi_0).T.astype(compute_dtype)
    w1t = jnp.asarray(wi_1).T.astype(compute_dtype)
    wot = jnp.asarray(wo).T.astype(compute_dtype)
    return w0t, w1t, wot


def t5_ffn_apply(hidden_states, w0t, w1t, wot, *, tm=None, tf=None,
                 gelu_approximate=True, gate_dtype=None, out_dtype=None):
    """Hot path.  hidden_states: [..., d_model]; weights from prepare_t5_ffn_weights.

    gelu_approximate=True  -> 'gelu_new' (tanh), the usual gated-T5 config.
    gelu_approximate=False -> exact erf GELU ('gelu').
    gate_dtype: dtype for the elementwise gate (default = compute dtype;
                pass jnp.float32 on v5e, which has no bf16 VPU).
    """
    orig_shape = hidden_states.shape
    d_model = orig_shape[-1]
    d_model_w, d_ff = w0t.shape
    assert d_model_w == d_model
    assert w1t.shape == (d_model, d_ff) and wot.shape == (d_ff, d_model)
    M = math.prod(orig_shape[:-1])

    compute_dtype = w0t.dtype
    out_dtype = hidden_states.dtype if out_dtype is None else out_dtype
    gate_dtype = compute_dtype if gate_dtype is None else gate_dtype
    f32_out = jnp.dtype(out_dtype) == jnp.dtype(jnp.float32)
    in_bytes = jnp.dtype(compute_dtype).itemsize
    out_bytes = jnp.dtype(out_dtype).itemsize
    gate_bytes = jnp.dtype(gate_dtype).itemsize

    # VMEM limit: 85% of physical capacity capped at 100 MiB (v5e/v6e: 128 MiB,
    # v7x: 64 MiB); tile-selection budget is 80% of that.
    try:
        vmem_cap = int(pltpu.get_tpu_info().vmem_capacity_bytes)
    except Exception:  # interpret mode / query unavailable
        vmem_cap = 64 * 1024 * 1024
    vmem_limit = min(int(vmem_cap * 0.85), 100 * 1024 * 1024)
    budget = int(0.8 * vmem_limit)

    mode, tm_sel, tf_sel = _choose_config(M, d_model, d_ff, in_bytes, out_bytes,
                                          gate_bytes, f32_out, budget)
    if tm is not None:
        tm_sel = int(tm)
    if tf is not None:
        tf_sel = int(tf)
        mode = "resident" if tf_sel == d_ff else "tiled"
    assert M % tm_sel == 0 and d_ff % tf_sel == 0

    x2d = hidden_states.reshape(M, d_model).astype(compute_dtype)

    cost = pl.CostEstimate(
        flops=6 * M * d_model * d_ff,
        transcendentals=M * d_ff,
        bytes_accessed=M * d_model * (in_bytes + out_bytes)
                       + 3 * d_model * d_ff * in_bytes)

    if mode == "resident":
        kernel = functools.partial(_resident_kernel,
                                   approximate=gelu_approximate,
                                   gate_dtype=gate_dtype)
        grid = (M // tm_sel,)
        in_specs = [
            pl.BlockSpec((tm_sel, d_model), lambda i: (i, 0)),   # x tile
            pl.BlockSpec((d_model, d_ff), lambda i: (0, 0)),     # wi_0.T (resident)
            pl.BlockSpec((d_model, d_ff), lambda i: (0, 0)),     # wi_1.T (resident)
            pl.BlockSpec((d_ff, d_model), lambda i: (0, 0)),     # wo.T   (resident)
        ]
        out_specs = pl.BlockSpec((tm_sel, d_model), lambda i: (i, 0))
        scratch = []
        dims = ("parallel",)
    else:
        grid = (M // tm_sel, d_ff // tf_sel)                     # reduction axis last
        in_specs = [
            pl.BlockSpec((tm_sel, d_model), lambda i, j: (i, 0)),
            pl.BlockSpec((d_model, tf_sel), lambda i, j: (0, j)),
            pl.BlockSpec((d_model, tf_sel), lambda i, j: (0, j)),
            pl.BlockSpec((tf_sel, d_model), lambda i, j: (j, 0)),
        ]
        out_specs = pl.BlockSpec((tm_sel, d_model), lambda i, j: (i, 0))
        if f32_out:
            kernel = functools.partial(_tiled_kernel_f32out,
                                       approximate=gelu_approximate,
                                       gate_dtype=gate_dtype)
            scratch = []
        else:
            kernel = functools.partial(_tiled_kernel_scratch,
                                       approximate=gelu_approximate,
                                       gate_dtype=gate_dtype)
            scratch = [pltpu.VMEM((tm_sel, d_model), jnp.float32)]
        dims = ("parallel", "arbitrary")

    out2d = pl.pallas_call(
        kernel,
        out_shape=jax.ShapeDtypeStruct((M, d_model), out_dtype),
        grid_spec=pltpu.PrefetchScalarGridSpec(
            num_scalar_prefetch=0,
            grid=grid,
            in_specs=in_specs,
            out_specs=out_specs,
            scratch_shapes=scratch,
        ),
        compiler_params=pltpu.CompilerParams(
            dimension_semantics=dims,
            vmem_limit_bytes=vmem_limit),
        cost_estimate=cost,
    )(x2d, w0t, w1t, wot)

    return out2d.reshape(orig_shape)


def t5_dense_gated_act_dense(hidden_states, wi_0, wi_1, wo, *,
                             compute_dtype=jnp.bfloat16, **kwargs):
    """Convenience one-shot wrapper taking native PyTorch-layout weights.
    Prefer prepare_t5_ffn_weights(...) once + t5_ffn_apply(...) per call."""
    w0t, w1t, wot = prepare_t5_ffn_weights(wi_0, wi_1, wo, compute_dtype)
    return t5_ffn_apply(hidden_states, w0t, w1t, wot, **kwargs)


# --------------------------------------------------------------------------
# Reference + self-test
# --------------------------------------------------------------------------

def _reference(x, wi_0, wi_1, wo, approximate=True):
    p = jax.lax.Precision.HIGHEST
    h0 = jnp.einsum("bsd,fd->bsf", x, wi_0, precision=p)
    h1 = jnp.einsum("bsd,fd->bsf", x, wi_1, precision=p)
    h = jax.nn.gelu(h0, approximate=approximate) * h1
    return jnp.einsum("bsf,df->bsd", h, wo, precision=p)


if __name__ == "__main__":
    batch, seq, d_model, d_ff = 2, 8, 32, 256

    key = jax.random.PRNGKey(0)
    kx, k0, k1, k2 = jax.random.split(key, 4)
    x = jax.random.normal(kx, (batch, seq, d_model), dtype=jnp.float32)
    # PyTorch nn.Linear weight layouts: wi_*: [d_ff, d_model], wo: [d_model, d_ff].
    wi_0 = jax.random.normal(k0, (d_ff, d_model), dtype=jnp.float32) * 0.05
    wi_1 = jax.random.normal(k1, (d_ff, d_model), dtype=jnp.float32) * 0.05
    wo = jax.random.normal(k2, (d_model, d_ff), dtype=jnp.float32) * 0.05

    ref = _reference(x, wi_0, wi_1, wo, approximate=True)

    # 1) bf16 compute, weights prepared once, weights-resident path, f32 output.
    w0t, w1t, wot = prepare_t5_ffn_weights(wi_0, wi_1, wo, jnp.bfloat16)
    out = jax.block_until_ready(t5_ffn_apply(x, w0t, w1t, wot))
    assert out.shape == (batch, seq, d_model) and out.dtype == jnp.float32
    assert jnp.allclose(out, ref, atol=2e-2, rtol=2e-2)

    # 2) Forced d_ff-tiled path, bf16 output (f32 scratch accumulator + cast).
    out_bf16 = jax.block_until_ready(
        t5_ffn_apply(x.astype(jnp.bfloat16), w0t, w1t, wot, tf=128))
    assert out_bf16.dtype == jnp.bfloat16
    assert jnp.allclose(out_bf16.astype(jnp.float32), ref, atol=3e-2, rtol=3e-2)

    # 3) float32 escape hatch, tiled path with in-place f32 accumulation.
    w0f, w1f, wof = prepare_t5_ffn_weights(wi_0, wi_1, wo, jnp.float32)
    out_f32 = jax.block_until_ready(t5_ffn_apply(x, w0f, w1f, wof, tf=128))
    assert out_f32.dtype == jnp.float32
    assert jnp.allclose(out_f32, ref, atol=2e-2, rtol=2e-2)

    print("KERNEL_OK")
</pallas_src>

<mosaic_0001>
module attributes {stable_mosaic.version = 11 : i64} {
  func.func @_resident_kernel(%arg0: i32, %arg1: memref<16x32xbf16, #tpu.memory_space<vmem>>, %arg2: memref<32x256xbf16, #tpu.memory_space<vmem>>, %arg3: memref<32x256xbf16, #tpu.memory_space<vmem>>, %arg4: memref<256x32xbf16, #tpu.memory_space<vmem>>, %arg5: memref<16x32xf32, #tpu.memory_space<vmem>>) attributes {dimension_semantics = [#tpu.dimension_semantics<parallel>], iteration_bounds = array<i64: 1>, scalar_prefetch = 0 : i64, scratch_operands = 0 : i64, tpu.core_type = #tpu.core_type<tc>, window_params = [{transform_indices = @transform_0, window_bounds = array<i64: 16, 32>}, {pipeline_mode = #tpu.pipeline_mode<synchronous>, transform_indices = @transform_1, window_bounds = array<i64: 32, 256>}, {pipeline_mode = #tpu.pipeline_mode<synchronous>, transform_indices = @transform_2, window_bounds = array<i64: 32, 256>}, {pipeline_mode = #tpu.pipeline_mode<synchronous>, transform_indices = @transform_3, window_bounds = array<i64: 256, 32>}, {transform_indices = @transform_4, window_bounds = array<i64: 16, 32>}]} {
    %c0 = arith.constant 0 : index
    %c0_0 = arith.constant 0 : index
    %0 = vector.load %arg1[%c0, %c0_0] : memref<16x32xbf16, #tpu.memory_space<vmem>>, vector<16x32xbf16>
    %c0_1 = arith.constant 0 : index
    %c0_2 = arith.constant 0 : index
    %1 = vector.load %arg2[%c0_1, %c0_2] : memref<32x256xbf16, #tpu.memory_space<vmem>>, vector<32x256xbf16>
    %cst = arith.constant dense<0.000000e+00> : vector<16x256xf32>
    %2 = tpu.matmul %0, %1, %cst {dimension_numbers = #tpu.dot_dimension_numbers<[1], [0], [0], [1], [0, 0, 1, 1], [], []>} : vector<16x32xbf16>, vector<32x256xbf16>, vector<16x256xf32> -> vector<16x256xf32>
    %c0_3 = arith.constant 0 : index
    %c0_4 = arith.constant 0 : index
    %3 = vector.load %arg3[%c0_3, %c0_4] : memref<32x256xbf16, #tpu.memory_space<vmem>>, vector<32x256xbf16>
    %cst_5 = arith.constant dense<0.000000e+00> : vector<16x256xf32>
    %4 = tpu.matmul %0, %3, %cst_5 {dimension_numbers = #tpu.dot_dimension_numbers<[1], [0], [0], [1], [0, 0, 1, 1], [], []>} : vector<16x32xbf16>, vector<32x256xbf16>, vector<16x256xf32> -> vector<16x256xf32>
    %5 = arith.truncf %2 : vector<16x256xf32> to vector<16x256xbf16>
    %6 = arith.mulf %5, %5 : vector<16x256xbf16>
    %7 = arith.mulf %5, %6 : vector<16x256xbf16>
    %cst_6 = arith.constant 4.467770e-02 : bf16
    %8 = vector.broadcast %cst_6 : bf16 to vector<16x256xbf16>
    %9 = arith.mulf %8, %7 : vector<16x256xbf16>
    %10 = arith.addf %5, %9 : vector<16x256xbf16>
    %cst_7 = arith.constant 7.968750e-01 : bf16
    %11 = vector.broadcast %cst_7 : bf16 to vector<16x256xbf16>
    %12 = arith.mulf %11, %10 : vector<16x256xbf16>
    %13 = math.tanh %12 : vector<16x256xbf16>
    %cst_8 = arith.constant 1.000000e+00 : bf16
    %14 = vector.broadcast %cst_8 : bf16 to vector<16x256xbf16>
    %15 = arith.addf %14, %13 : vector<16x256xbf16>
    %cst_9 = arith.constant 5.000000e-01 : bf16
    %16 = vector.broadcast %cst_9 : bf16 to vector<16x256xbf16>
    %17 = arith.mulf %16, %15 : vector<16x256xbf16>
    %18 = arith.mulf %5, %17 : vector<16x256xbf16>
    %19 = arith.truncf %4 : vector<16x256xf32> to vector<16x256xbf16>
    %20 = arith.mulf %18, %19 : vector<16x256xbf16>
    %c0_10 = arith.constant 0 : index
    %c0_11 = arith.constant 0 : index
    %21 = vector.load %arg4[%c0_10, %c0_11] : memref<256x32xbf16, #tpu.memory_space<vmem>>, vector<256x32xbf16>
    %cst_12 = arith.constant dense<0.000000e+00> : vector<16x32xf32>
    %22 = tpu.matmul %20, %21, %cst_12 {dimension_numbers = #tpu.dot_dimension_numbers<[1], [0], [0], [1], [0, 0, 1, 1], [], []>} : vector<16x256xbf16>, vector<256x32xbf16>, vector<16x32xf32> -> vector<16x32xf32>
    %c0_13 = arith.constant 0 : index
    %c0_14 = arith.constant 0 : index
    %23 = vector.load %arg5[%c0_13, %c0_14] : memref<16x32xf32, #tpu.memory_space<vmem>>, vector<16x32xf32>
    tpu.vector_store %arg5[%c0_13, %c0_14], %22 {strides = array<i32>} : memref<16x32xf32, #tpu.memory_space<vmem>>, vector<16x32xf32>,
    return
  }
  func.func @transform_0(%arg0: i32) -> (i32, i32) {
    %c0_i32 = arith.constant 0 : i32
    %c0_i32_0 = arith.constant 0 : i32
    return %arg0, %c0_i32 : i32, i32
  }
  func.func @transform_1(%arg0: i32) -> (i32, i32) {
    %c0_i32 = arith.constant 0 : i32
    %c0_i32_0 = arith.constant 0 : i32
    %c0_i32_1 = arith.constant 0 : i32
    return %c0_i32, %c0_i32_0 : i32, i32
  }
  func.func @transform_2(%arg0: i32) -> (i32, i32) {
    %c0_i32 = arith.constant 0 : i32
    %c0_i32_0 = arith.constant 0 : i32
    %c0_i32_1 = arith.constant 0 : i32
    return %c0_i32, %c0_i32_0 : i32, i32
  }
  func.func @transform_3(%arg0: i32) -> (i32, i32) {
    %c0_i32 = arith.constant 0 : i32
    %c0_i32_0 = arith.constant 0 : i32
    %c0_i32_1 = arith.constant 0 : i32
    return %c0_i32, %c0_i32_0 : i32, i32
  }
  func.func @transform_4(%arg0: i32) -> (i32, i32) {
    %c0_i32 = arith.constant 0 : i32
    %c0_i32_0 = arith.constant 0 : i32
    return %arg0, %c0_i32 : i32, i32
  }
}

</mosaic_0001>

<bundles_post_ra>
// kernel: tpu_custom_call.1
= control target key start
LH: loop header
LB: loop body
LE: loop exit
PB: predicated region body
PF: predicated region fallthrough
CT: control target
= control target key end

     0   :  { %s748_s0 = inlined_call_operand.vmem [shape: bf16[16,32], index: 0, kind: input, shape index: {}]   ;;  %s749_s1 = inlined_call_operand.vmem [shape: bf16[32,256], index: 1, kind: input, shape index: {}]   ;;  %s750_s2 = inlined_call_operand.vmem [shape: bf16[32,256], index: 2, kind: input, shape index: {}]   ;;  %s751_s3 = inlined_call_operand.vmem [shape: bf16[256,32], index: 3, kind: input, shape index: {}]   ;;  %s752_s4 = inlined_call_operand.hbm [shape: f32[16,32], index: 4, kind: output, shape index: {}]  }
   0x1   :  { %v432_v0 = vld [vmem:[%s749_s1 + $0x10] sm:$0xf]  ;;  %v526_v1 = vld [vmem:[%s749_s1 + $0x14] sm:$0xf0]  ;;  %v525_v2 = vld [vmem:[%s749_s1 + $0x14] sm:$0xf] }
   0x2   :  { %v433_v3 = vor.u32 %v526_v1, %v432_v0  ;;  %v434_v4 = vld [vmem:[%s749_s1 + $0x18] sm:$0xf0]  ;;  %v424_v5 = vld [vmem:[%s749_s1] sm:$0xf]  ;;  %v524_v6 = vld [vmem:[%s749_s1 + $0x4] sm:$0xf0] }
   0x3   :  { %v437_v7 = vor.u32 %v525_v2, %v434_v4  ;;  %v523_v8 = vld [vmem:[%s749_s1 + $0x4] sm:$0xf]  ;;  %v426_v9 = vld [vmem:[%s749_s1 + $0x8] sm:$0xf0]  ;;  %v425_v10 = vor.u32 %v524_v6, %v424_v5  ;;  %v450_v11 = vld [vmem:[%s750_s2 + $0x10] sm:$0xf] }
   0x4   :  { %60 = vmatpush.bf16.msra.mxu2 %v433_v3  ;;  %v530_v12 = vld [vmem:[%s750_s2 + $0x14] sm:$0xf0]  ;;  %v529_v13 = vld [vmem:[%s750_s2 + $0x14] sm:$0xf]  ;;  %v429_v14 = vor.u32 %v523_v8, %v426_v9  ;;  %v452_v16 = vld [vmem:[%s750_s2 + $0x18] sm:$0xf0] }
   0x5   :  { %74 = vmatpush.bf16.msra.mxu3 %v437_v7  ;;  %v451_v15 = vor.u32 %v530_v12, %v450_v11  ;;  %v455_v17 = vor.u32 %v529_v13, %v452_v16  ;;  %v442_v18 = vld [vmem:[%s750_s2] sm:$0xf]  ;;  %v528_v19 = vld [vmem:[%s750_s2 + $0x4] sm:$0xf0] }
   0x6   :  { %9 = vsyncpa [#allocation3], 0  ;;  %v522_v20 = vld [vmem:[%s748_s0] sm:$0xff]  ;;  %v444_v22 = vld [vmem:[%s750_s2 + $0x8] sm:$0xf0]  ;;  %vm50_vm0 = vcmask 261120   ;;  %v443_v23 = vor.u32 %v528_v19, %v442_v18 }
   0x7   :  { %v527_v21 = vld [vmem:[%s750_s2 + $0x4] sm:$0xf]  ;;  %v538_v42 = vld [vmem:[%s751_s3 + $0x38] sm:$0xff]  ;;  %v537_v47 = vld [vmem:[%s751_s3 + $0x30] sm:$0xff]  ;;  %s406_s26 = sshll.u32 %s752_s4, 4  ;;  %s585_s27 = smov 128   ;;  %s407_s26 = int_to_ptr.hbm [resolvable:$true] %s406_s26 }
   0x8   :  { %61 = vmatpush.bf16.msra.mxu2 %v425_v10  ;;  %v447_v24 = vor.u32 %v527_v21, %v444_v22  ;;  %v546_v43 = vld [vmem:[%s751_s3 + $0x78] sm:$0xff]  ;;  %370 = vmatpush.bf16.msra.mxu0 %v538_v42  ;;  %v545_v48 = vld [vmem:[%s751_s3 + $0x70] sm:$0xff]  ;;  %v536_v56 = vld [vmem:[%s751_s3 + $0x28] sm:$0xff]  ;;  %s586_s28 = smov 8  }
   0x9   :  { %75 = vmatpush.bf16.msra.mxu3 %v429_v14  ;;  %384 = vmatpush.bf16.msra.mxu1 %v546_v43  ;;  %v544_v57 = vld [vmem:[%s751_s3 + $0x68] sm:$0xff]  ;;  %v535_v0 = vld [vmem:[%s751_s3 + $0x20] sm:$0xff]  ;;  %v534_v9 = vld [vmem:[%s751_s3 + $0x18] sm:$0xff] }
   0xa   :  { %v543_v1 = vld [vmem:[%s751_s3 + $0x60] sm:$0xff]  ;;  %v542_v10 = vld [vmem:[%s751_s3 + $0x58] sm:$0xff]  ;;  %v533_v18 = vld [vmem:[%s751_s3 + $0x10] sm:$0xff] }
   0xb   :  { %438 = vmatmul.msk.bf16.vlgmr.msra.gmra.mxu2 %vm50_vm0, %v522_v20  ;;  %v541_v19 = vld [vmem:[%s751_s3 + $0x50] sm:$0xff] }
   0xc   :  { %112 = vmatpush.bf16.msrb.mxu2 %v451_v15  ;;  %439 = vmatmul.msk.bf16.vlgmr.msra.gmra.mxu3 %vm50_vm0, %v522_v20 }
   0xd   :  { %126 = vmatpush.bf16.msrb.mxu3 %v455_v17  ;;  %371 = vmatpush.bf16.msra.mxu0 %v537_v47 }
   0xe   :  { %385 = vmatpush.bf16.msra.mxu1 %v545_v48 }
  0x10   :  { %113 = vmatpush.bf16.msrb.mxu2 %v443_v23 }
  0x11   :  { %127 = vmatpush.bf16.msrb.mxu3 %v447_v24  ;;  %372 = vmatpush.bf16.msra.mxu0 %v536_v56 }
  0x12   :  { %386 = vmatpush.bf16.msra.mxu1 %v544_v57 }
  0x15   :  { %373 = vmatpush.bf16.msra.mxu0 %v535_v0 }
  0x16   :  { %387 = vmatpush.bf16.msra.mxu1 %v543_v1 }
  0x19   :  { %374 = vmatpush.bf16.msra.mxu0 %v534_v9 }
  0x1a   :  { %388 = vmatpush.bf16.msra.mxu1 %v542_v10 }
  0x1b   :  { %456 = vmatmul.msk.bf16.vlgmr.msrb.gmra.mxu2 %vm50_vm0, %v522_v20 }
  0x1c   :  { %457 = vmatmul.msk.bf16.vlgmr.msrb.gmra.mxu3 %vm50_vm0, %v522_v20 }
  0x1d   :  { %375 = vmatpush.bf16.msra.mxu0 %v533_v18 }
  0x1e   :  { %389 = vmatpush.bf16.msra.mxu1 %v541_v19 }
  0x8e   :  { %v63_v25 = vpop.f32.mrf.mxu2 }
  0x8f   :  { %v77_v26 = vpop.f32.mrf.mxu3 }
  0x90   :  { %v134_v27 = vpack.c.bf16 %v77_v26, %v63_v25  ;;  %v532_v26 = vld [vmem:[%s751_s3 + $0x8] sm:$0xff] }
  0x91   :  { %376 = vmatpush.bf16.msra.mxu0 %v532_v26 }
  0x92   :  { %v667_v28 = vunpack.c.l.bf16 %v134_v27  ;;  %v669_v29 = vunpack.c.h.bf16 %v134_v27  ;;  %v540_v27 = vld [vmem:[%s751_s3 + $0x48] sm:$0xff] }
  0x93   :  { %390 = vmatpush.bf16.msra.mxu1 %v540_v27 }
  0x94   :  { %v140_v30 = vmul.f32 %v667_v28, %v667_v28  ;;  %v141_v31 = vmul.f32 %v669_v29, %v669_v29 }
  0x96   :  { %v144_v32 = vpack.c.bf16 %v141_v31, %v140_v30  ;;  %v65_v33 = vpop.f32.mrf.mxu2 }
  0x97   :  { %v79_v34 = vpop.f32.mrf.mxu3 }
  0x98   :  { %v146_v35 = vunpack.c.l.bf16 %v144_v32  ;;  %v147_v36 = vunpack.c.h.bf16 %v144_v32  ;;  %v135_v37 = vpack.c.bf16 %v79_v34, %v65_v33  ;;  %v531_v34 = vld [vmem:[%s751_s3] sm:$0xff] }
  0x99   :  { %377 = vmatpush.bf16.msra.mxu0 %v531_v34 }
  0x9a   :  { %v150_v38 = vmul.f32 %v146_v35, %v667_v28  ;;  %v151_v39 = vmul.f32 %v147_v36, %v669_v29  ;;  %v677_v40 = vunpack.c.l.bf16 %v135_v37  ;;  %v679_v41 = vunpack.c.h.bf16 %v135_v37  ;;  %v539_v35 = vld [vmem:[%s751_s3 + $0x40] sm:$0xff]  ;;  %s584_s3 = smov [#allocation2]  }
  0x9b   :  { %391 = vmatpush.bf16.msra.mxu1 %v539_v35  ;;  %s404_s23 = sshll.u32 %s584_s3, 4  ;;  %s405_s23 = int_to_ptr.vmem [resolvable:$true] %s404_s23 }
  0x9c   :  { %v154_v44 = vpack.c.bf16 %v151_v39, %v150_v38  ;;  %v142_v45 = vmul.f32 %v677_v40, %v677_v40  ;;  %v143_v46 = vmul.f32 %v679_v41, %v679_v41 }
  0x9e   :  { %v156_v49 = vunpack.c.l.bf16 %v154_v44  ;;  %v157_v50 = vunpack.c.h.bf16 %v154_v44  ;;  %v145_v51 = vpack.c.bf16 %v143_v46, %v142_v45 }
  0xa0   :  { %v160_v52 = vmul.f32 0.044677734, %v156_v49  ;;  %v161_v53 = vmul.f32 0.044677734, %v157_v50  ;;  %v148_v54 = vunpack.c.l.bf16 %v145_v51  ;;  %v149_v55 = vunpack.c.h.bf16 %v145_v51 }
  0xa2   :  { %v164_v58 = vpack.c.bf16 %v161_v53, %v160_v52  ;;  %v152_v59 = vmul.f32 %v148_v54, %v677_v40  ;;  %v153_v60 = vmul.f32 %v149_v55, %v679_v41 }
  0xa4   :  { %v166_v61 = vunpack.c.l.bf16 %v164_v58  ;;  %v167_v62 = vunpack.c.h.bf16 %v164_v58  ;;  %v155_v63 = vpack.c.bf16 %v153_v60, %v152_v59  ;;  %v115_v58 = vpop.f32.mrf.mxu2  ;;  %v129_v59 = vpop.f32.mrf.mxu3 }
  0xa5   :  { %v226_v9 = vpack.c.bf16 %v129_v59, %v115_v58 }
  0xa6   :  { %v170_v2 = vadd.f32 %v166_v61, %v667_v28  ;;  %v171_v3 = vadd.f32 %v167_v62, %v669_v29  ;;  %v158_v4 = vunpack.c.l.bf16 %v155_v63  ;;  %v159_v5 = vunpack.c.h.bf16 %v155_v63 }
  0xa7   :  { %v232_v18 = vunpack.c.l.bf16 %v226_v9  ;;  %v233_v19 = vunpack.c.h.bf16 %v226_v9 }
  0xa8   :  { %v174_v6 = vpack.c.bf16 %v171_v3, %v170_v2  ;;  %v162_v7 = vmul.f32 0.044677734, %v158_v4  ;;  %v163_v8 = vmul.f32 0.044677734, %v159_v5 }
  0xaa   :  { %v176_v11 = vunpack.c.l.bf16 %v174_v6  ;;  %v177_v12 = vunpack.c.h.bf16 %v174_v6  ;;  %v165_v13 = vpack.c.bf16 %v163_v8, %v162_v7 }
  0xac   :  { %v180_v14 = vmul.f32 0.796875, %v176_v11  ;;  %v181_v15 = vmul.f32 0.796875, %v177_v12  ;;  %v168_v16 = vunpack.c.l.bf16 %v165_v13  ;;  %v169_v17 = vunpack.c.h.bf16 %v165_v13  ;;  %v117_v10 = vpop.f32.mrf.mxu2  ;;  %v131_v11 = vpop.f32.mrf.mxu3 }
  0xae   :  { %v184_v20 = vpack.c.bf16 %v181_v15, %v180_v14  ;;  %v172_v21 = vadd.f32 %v168_v16, %v677_v40  ;;  %v173_v22 = vadd.f32 %v169_v17, %v679_v41  ;;  %v227_v15 = vpack.c.bf16 %v131_v11, %v117_v10 }
  0xb0   :  { %v186_v23 = vunpack.c.l.bf16 %v184_v20  ;;  %v187_v24 = vunpack.c.h.bf16 %v184_v20  ;;  %v175_v25 = vpack.c.bf16 %v173_v22, %v172_v21 }
  0xb2   :  { %550 = vtanh.f32 %v186_v23  ;;  %v178_v30 = vunpack.c.l.bf16 %v175_v25  ;;  %v179_v31 = vunpack.c.h.bf16 %v175_v25  ;;  %v235_v23 = vunpack.c.h.bf16 %v227_v15 }
  0xb3   :  { %552 = vtanh.f32 %v187_v24 }
  0xb4   :  { %v182_v32 = vmul.f32 0.796875, %v178_v30  ;;  %v183_v33 = vmul.f32 0.796875, %v179_v31 }
  0xb6   :  { %v185_v36 = vpack.c.bf16 %v183_v33, %v182_v32 }
  0xb8   :  { %v551_v37 = vpop.eup %550  ;;  %v188_v38 = vunpack.c.l.bf16 %v185_v36  ;;  %v189_v39 = vunpack.c.h.bf16 %v185_v36 }
  0xb9   :  { %v553_v42 = vpop.eup %552 }
  0xba   :  { %554 = vtanh.f32 %v188_v38  ;;  %v194_v43 = vpack.c.bf16 %v553_v42, %v551_v37 }
  0xbb   :  { %556 = vtanh.f32 %v189_v39 }
  0xbc   :  { %v196_v44 = vunpack.c.l.bf16 %v194_v43  ;;  %v197_v45 = vunpack.c.h.bf16 %v194_v43 }
  0xbe   :  { %v200_v46 = vadd.f32 1.0, %v196_v44  ;;  %v201_v47 = vadd.f32 1.0, %v197_v45 }
  0xc0   :  { %v555_v48 = vpop.eup %554  ;;  %v204_v49 = vpack.c.bf16 %v201_v47, %v200_v46 }
  0xc1   :  { %v557_v50 = vpop.eup %556 }
  0xc2   :  { %v195_v51 = vpack.c.bf16 %v557_v50, %v555_v48  ;;  %v206_v52 = vunpack.c.l.bf16 %v204_v49  ;;  %v207_v53 = vunpack.c.h.bf16 %v204_v49 }
  0xc4   :  { %v198_v54 = vunpack.c.l.bf16 %v195_v51  ;;  %v199_v55 = vunpack.c.h.bf16 %v195_v51  ;;  %v210_v56 = vmul.f32 0.5, %v206_v52  ;;  %v211_v57 = vmul.f32 0.5, %v207_v53 }
  0xc6   :  { %v202_v60 = vadd.f32 1.0, %v198_v54  ;;  %v203_v61 = vadd.f32 1.0, %v199_v55  ;;  %v214_v62 = vpack.c.bf16 %v211_v57, %v210_v56 }
  0xc8   :  { %v205_v63 = vpack.c.bf16 %v203_v61, %v202_v60  ;;  %v216_v0 = vunpack.c.l.bf16 %v214_v62  ;;  %v217_v1 = vunpack.c.h.bf16 %v214_v62 }
  0xca   :  { %v208_v2 = vunpack.c.l.bf16 %v205_v63  ;;  %v209_v3 = vunpack.c.h.bf16 %v205_v63  ;;  %v220_v6 = vmul.f32 %v216_v0, %v667_v28  ;;  %v221_v7 = vmul.f32 %v217_v1, %v669_v29 }
  0xcb   :  { %v234_v28 = vunpack.c.l.bf16 %v227_v15 }
  0xcc   :  { %v212_v4 = vmul.f32 0.5, %v208_v2  ;;  %v213_v5 = vmul.f32 0.5, %v209_v3  ;;  %v224_v14 = vpack.c.bf16 %v221_v7, %v220_v6 }
  0xce   :  { %v215_v8 = vpack.c.bf16 %v213_v5, %v212_v4  ;;  %v228_v21 = vunpack.c.l.bf16 %v224_v14  ;;  %v229_v22 = vunpack.c.h.bf16 %v224_v14 }
  0xd0   :  { %v218_v12 = vunpack.c.l.bf16 %v215_v8  ;;  %v219_v13 = vunpack.c.h.bf16 %v215_v8  ;;  %v236_v25 = vmul.f32 %v232_v18, %v228_v21  ;;  %v237_v27 = vmul.f32 %v233_v19, %v229_v22 }
  0xd2   :  { %v222_v16 = vmul.f32 %v218_v12, %v677_v40  ;;  %v223_v17 = vmul.f32 %v219_v13, %v679_v41 }
  0xd4   :  { %v225_v20 = vpack.c.bf16 %v223_v17, %v222_v16 }
  0xd6   :  { %v230_v29 = vunpack.c.l.bf16 %v225_v20  ;;  %v231_v24 = vunpack.c.h.bf16 %v225_v20 }
  0xd8   :  { %v238_v26 = vmul.f32 %v234_v28, %v230_v29  ;;  %v239_v30 = vmul.f32 %v235_v23, %v231_v24 }
  0xda   :  { %v240_v31 = vpack.c.bf16 %v238_v26, %v236_v25  ;;  %v241_v32 = vpack.c.bf16 %v239_v30, %v237_v27 }
  0xdc   :  { %378 = vmatmul.bf16.vlgmr.msra.gmra.mxu0 %v240_v31  ;;  %392 = vmatmul.bf16.vlgmr.msra.gmra.mxu1 %v241_v32 }
 0x159   :  { %v379_v40 = vpop.f32.mrf.mxu0  ;;  %v393_v33 = vpop.f32.mrf.mxu1 }
 0x15a   :  { %v394_v41 = vadd.f32 %v393_v33, %v379_v40 }
 0x15c   :  { %398 = vst.msk [vmem:[#allocation2] sm:$0xff] %vm50_vm0, %v394_v41 }
 0x161   :  { %v381_v34 = vpop.f32.mrf.mxu0  ;;  %v395_v35 = vpop.f32.mrf.mxu1 }
 0x162   :  { %v396_v36 = vadd.f32 %v395_v35, %v381_v34 }
 0x164   :  { %399 = vst.msk [vmem:[#allocation2 + $0x8] sm:$0xff] %vm50_vm0, %v396_v36 }
 0x165   :  { %412 = dma.vmem_to_hbm [thread:$0]  %s405_s23, 256, %s407_s26, [#allocation3], %s585_s27, %s585_s27, %s586_s28  }
 0x166   :  { %582 = dma.done.wait [#allocation3], 256  }
 0x167   :  { %583 = vsyncadd [#allocation3], 4294967040 }
 0x168   :  { %417 = vsyncpa [#allocation3], 1 }

</bundles_post_ra>
